<compile_context>
chip_gen: v6e
topology: v6e:2x2x1
jax: 0.10.0
libtpu: 0.0.40
codegen_flags: <defaults>
</compile_context>

<pallas_src>
import jax
import jax.numpy as jnp
from jax.experimental import pallas as pl
from jax.experimental.pallas import tpu as pltpu

_MIB = 1 << 20
_LANE = 128


def _dog_kernel(x_ref, out_ref):
    # x_ref:   (n_tile, D,   r_tile, 128)
    # out_ref: (n_tile, D-1, r_tile, 128)
    n_out = out_ref.shape[1]  # D - 1, small and static -> unrolled
    for d in range(n_out):
        out_ref[:, d : d + 1, :, :] = (
            x_ref[:, d + 1 : d + 2, :, :] - x_ref[:, d : d + 1, :, :]
        )


def _vmem_budget():
    """(double-buffered in+out byte budget, scoped vmem limit) per generation."""
    cap = 64 * _MIB  # conservative default (v7x-sized) if the query fails
    try:
        info = pltpu.get_tpu_info()
        cap = int(getattr(info, "vmem_capacity_bytes", cap))
    except Exception:
        pass
    if cap <= 64 * _MIB:
        # v7x: 64 MiB VMEM per TensorCore -> big tiles but leave scratch headroom
        return 40 * _MIB, 48 * _MIB
    # v5e / v6e: 128 MiB physical; explicit limit > v5e's 16 MiB default
    return 32 * _MIB, 48 * _MIB


def _choose_tiles(N: int, D: int, R: int, itemsize: int, budget: int):
    """Pick (n_tile, r_tile) for blocks of shape (n_tile, D, r_tile, 128)."""
    pack = max(8, 32 // itemsize)  # sublane multiple: 8 (f32) / 16 (bf16) / 32 (i8)

    def block_bytes(n_tile: int, r_tile: int) -> int:
        padded_r = pl.cdiv(r_tile, pack) * pack
        # double-buffered input (D planes) + output (D-1 planes), lane dim 128
        return 2 * n_tile * (2 * D - 1) * padded_r * _LANE * itemsize

    # --- spatial tile: full extent, or a pack-aligned divisor, or a pack-aligned
    # non-divisor (Pallas masks the partial edge block) ---
    if block_bytes(1, R) <= budget:
        r_tile = R
    else:
        cands = [
            d
            for d in range(pack, R, pack)
            if R % d == 0 and block_bytes(1, d) <= budget
        ]
        if cands:
            r_tile = max(cands)
        else:
            per_row = 2 * (2 * D - 1) * _LANE * itemsize  # bytes per sublane row (x2 buf)
            max_r = (budget // per_row) // pack * pack
            r_tile = min(R, max(pack, max_r))

    num_r = pl.cdiv(R, r_tile)

    # --- coalesce several (b, c) slices per step while slabs are small, keeping
    # at least 2 total grid steps so both v7x TensorCores get work ---
    n_tile = 1
    while (
        n_tile * 2 <= N
        and N % (n_tile * 2) == 0
        and block_bytes(n_tile * 2, r_tile) <= budget
        and (N // (n_tile * 2)) * num_r >= 2
    ):
        n_tile *= 2

    # If N == 1 and the whole spatial extent fits one block, split it so the
    # second TensorCore on v7x is not idle.
    if N // n_tile == 1 and pl.cdiv(R, r_tile) < 2 and R >= 2 * pack:
        r_tile = pl.cdiv(pl.cdiv(R, 2), pack) * pack

    return n_tile, r_tile, block_bytes(n_tile, r_tile)


def dog_response_pallas(x: jax.Array) -> jax.Array:
    """Difference-of-Gaussian response. x: (B, C, D, H, W) -> (B, C, D-1, H, W)."""
    assert x.ndim == 5, "expected (B, C, D, H, W)"
    B, C, D, H, W = x.shape
    assert D >= 2, "need at least 2 scales along D"
    N = B * C
    HW = H * W
    itemsize = x.dtype.itemsize

    # Flatten spatial dims to a lane-dense axis, padded to a 128 multiple so
    # every block is (r_tile, 128) on the vreg tile (unmasked lane stores).
    HW_pad = pl.cdiv(HW, _LANE) * _LANE
    x_flat = x.reshape(N, D, HW)
    if HW_pad != HW:
        x_flat = jnp.pad(x_flat, ((0, 0), (0, 0), (0, HW_pad - HW)))
    R = HW_pad // _LANE
    x4 = x_flat.reshape(N, D, R, _LANE)

    budget, vmem_limit = _vmem_budget()
    n_tile, r_tile, bb = _choose_tiles(N, D, R, itemsize, budget)
    vmem_limit = max(vmem_limit, bb + 8 * _MIB)

    grid = (N // n_tile, pl.cdiv(R, r_tile))
    in_spec = pl.BlockSpec((n_tile, D, r_tile, _LANE), lambda n, r: (n, 0, r, 0))
    out_spec = pl.BlockSpec((n_tile, D - 1, r_tile, _LANE), lambda n, r: (n, 0, r, 0))

    cost = pl.CostEstimate(
        flops=N * (D - 1) * HW_pad,
        transcendentals=0,
        bytes_accessed=(2 * D - 1) * N * HW_pad * itemsize,
    )

    out4 = pl.pallas_call(
        _dog_kernel,
        out_shape=jax.ShapeDtypeStruct((N, D - 1, R, _LANE), x.dtype),
        grid=grid,
        in_specs=[in_spec],
        out_specs=out_spec,
        compiler_params=pltpu.CompilerParams(
            dimension_semantics=("parallel", "parallel"),
            vmem_limit_bytes=int(vmem_limit),
        ),
        cost_estimate=cost,
    )(x4)

    out_flat = out4.reshape(N, D - 1, HW_pad)
    if HW_pad != HW:
        out_flat = out_flat[:, :, :HW]
    return out_flat.reshape(B, C, D - 1, H, W)


class BlobDoG:
    """JAX/Pallas equivalent of kornia.feature.BlobDoG (no parameters)."""

    def __call__(self, x: jax.Array, sigmas=None) -> jax.Array:
        # sigmas is unused in the reference forward as well.
        return dog_response_pallas(x)


if __name__ == "__main__":
    key = jax.random.PRNGKey(0)
    B, C, D, H, W = 2, 4, 5, 16, 16
    x = jax.random.normal(key, (B, C, D, H, W), dtype=jnp.float32)

    module = BlobDoG()
    out = module(x)
    out = jax.block_until_ready(out)

    # reference check against plain JAX semantics
    ref = x[:, :, 1:] - x[:, :, :-1]
    assert out.shape == (B, C, D - 1, H, W), out.shape
    assert jnp.allclose(out, ref, atol=1e-6), "mismatch vs reference"

    print("KERNEL_OK")
</pallas_src>

<mosaic_0001>
module attributes {stable_mosaic.version = 11 : i64} {
  func.func @_dog_kernel(%arg0: i32, %arg1: i32, %arg2: memref<4x5x2x128xf32, #tpu.memory_space<vmem>>, %arg3: memref<4x4x2x128xf32, #tpu.memory_space<vmem>>) attributes {dimension_semantics = [#tpu.dimension_semantics<parallel>, #tpu.dimension_semantics<parallel>], iteration_bounds = array<i64: 2, 1>, scalar_prefetch = 0 : i64, scratch_operands = 0 : i64, tpu.core_type = #tpu.core_type<tc>, window_params = [{transform_indices = @transform_0, window_bounds = array<i64: 4, 5, 2, 128>}, {transform_indices = @transform_1, window_bounds = array<i64: 4, 4, 2, 128>}]} {
    %c0 = arith.constant 0 : index
    %c1 = arith.constant 1 : index
    %c0_0 = arith.constant 0 : index
    %c0_1 = arith.constant 0 : index
    %0 = vector.load %arg2[%c0, %c1, %c0_0, %c0_1] : memref<4x5x2x128xf32, #tpu.memory_space<vmem>>, vector<4x1x2x128xf32>
    %c0_2 = arith.constant 0 : index
    %c0_3 = arith.constant 0 : index
    %c0_4 = arith.constant 0 : index
    %c0_5 = arith.constant 0 : index
    %1 = vector.load %arg2[%c0_2, %c0_3, %c0_4, %c0_5] : memref<4x5x2x128xf32, #tpu.memory_space<vmem>>, vector<4x1x2x128xf32>
    %2 = arith.subf %0, %1 : vector<4x1x2x128xf32>
    %c0_6 = arith.constant 0 : index
    %c0_7 = arith.constant 0 : index
    %c0_8 = arith.constant 0 : index
    %c0_9 = arith.constant 0 : index
    %3 = vector.load %arg3[%c0_6, %c0_7, %c0_8, %c0_9] : memref<4x4x2x128xf32, #tpu.memory_space<vmem>>, vector<4x1x2x128xf32>
    tpu.vector_store %arg3[%c0_6, %c0_7, %c0_8, %c0_9], %2 {strides = array<i32>} : memref<4x4x2x128xf32, #tpu.memory_space<vmem>>, vector<4x1x2x128xf32>,
    %c0_10 = arith.constant 0 : index
    %c2 = arith.constant 2 : index
    %c0_11 = arith.constant 0 : index
    %c0_12 = arith.constant 0 : index
    %4 = vector.load %arg2[%c0_10, %c2, %c0_11, %c0_12] : memref<4x5x2x128xf32, #tpu.memory_space<vmem>>, vector<4x1x2x128xf32>
    %c0_13 = arith.constant 0 : index
    %c1_14 = arith.constant 1 : index
    %c0_15 = arith.constant 0 : index
    %c0_16 = arith.constant 0 : index
    %5 = vector.load %arg2[%c0_13, %c1_14, %c0_15, %c0_16] : memref<4x5x2x128xf32, #tpu.memory_space<vmem>>, vector<4x1x2x128xf32>
    %6 = arith.subf %4, %5 : vector<4x1x2x128xf32>
    %c0_17 = arith.constant 0 : index
    %c1_18 = arith.constant 1 : index
    %c0_19 = arith.constant 0 : index
    %c0_20 = arith.constant 0 : index
    %7 = vector.load %arg3[%c0_17, %c1_18, %c0_19, %c0_20] : memref<4x4x2x128xf32, #tpu.memory_space<vmem>>, vector<4x1x2x128xf32>
    tpu.vector_store %arg3[%c0_17, %c1_18, %c0_19, %c0_20], %6 {strides = array<i32>} : memref<4x4x2x128xf32, #tpu.memory_space<vmem>>, vector<4x1x2x128xf32>,
    %c0_21 = arith.constant 0 : index
    %c3 = arith.constant 3 : index
    %c0_22 = arith.constant 0 : index
    %c0_23 = arith.constant 0 : index
    %8 = vector.load %arg2[%c0_21, %c3, %c0_22, %c0_23] : memref<4x5x2x128xf32, #tpu.memory_space<vmem>>, vector<4x1x2x128xf32>
    %c0_24 = arith.constant 0 : index
    %c2_25 = arith.constant 2 : index
    %c0_26 = arith.constant 0 : index
    %c0_27 = arith.constant 0 : index
    %9 = vector.load %arg2[%c0_24, %c2_25, %c0_26, %c0_27] : memref<4x5x2x128xf32, #tpu.memory_space<vmem>>, vector<4x1x2x128xf32>
    %10 = arith.subf %8, %9 : vector<4x1x2x128xf32>
    %c0_28 = arith.constant 0 : index
    %c2_29 = arith.constant 2 : index
    %c0_30 = arith.constant 0 : index
    %c0_31 = arith.constant 0 : index
    %11 = vector.load %arg3[%c0_28, %c2_29, %c0_30, %c0_31] : memref<4x4x2x128xf32, #tpu.memory_space<vmem>>, vector<4x1x2x128xf32>
    tpu.vector_store %arg3[%c0_28, %c2_29, %c0_30, %c0_31], %10 {strides = array<i32>} : memref<4x4x2x128xf32, #tpu.memory_space<vmem>>, vector<4x1x2x128xf32>,
    %c0_32 = arith.constant 0 : index
    %c4 = arith.constant 4 : index
    %c0_33 = arith.constant 0 : index
    %c0_34 = arith.constant 0 : index
    %12 = vector.load %arg2[%c0_32, %c4, %c0_33, %c0_34] : memref<4x5x2x128xf32, #tpu.memory_space<vmem>>, vector<4x1x2x128xf32>
    %c0_35 = arith.constant 0 : index
    %c3_36 = arith.constant 3 : index
    %c0_37 = arith.constant 0 : index
    %c0_38 = arith.constant 0 : index
    %13 = vector.load %arg2[%c0_35, %c3_36, %c0_37, %c0_38] : memref<4x5x2x128xf32, #tpu.memory_space<vmem>>, vector<4x1x2x128xf32>
    %14 = arith.subf %12, %13 : vector<4x1x2x128xf32>
    %c0_39 = arith.constant 0 : index
    %c3_40 = arith.constant 3 : index
    %c0_41 = arith.constant 0 : index
    %c0_42 = arith.constant 0 : index
    %15 = vector.load %arg3[%c0_39, %c3_40, %c0_41, %c0_42] : memref<4x4x2x128xf32, #tpu.memory_space<vmem>>, vector<4x1x2x128xf32>
    tpu.vector_store %arg3[%c0_39, %c3_40, %c0_41, %c0_42], %14 {strides = array<i32>} : memref<4x4x2x128xf32, #tpu.memory_space<vmem>>, vector<4x1x2x128xf32>,
    return
  }
  func.func @transform_0(%arg0: i32, %arg1: i32) -> (i32, i32, i32, i32) {
    %c0_i32 = arith.constant 0 : i32
    %c0_i32_0 = arith.constant 0 : i32
    %c0_i32_1 = arith.constant 0 : i32
    return %arg0, %c0_i32, %arg1, %c0_i32_0 : i32, i32, i32, i32
  }
  func.func @transform_1(%arg0: i32, %arg1: i32) -> (i32, i32, i32, i32) {
    %c0_i32 = arith.constant 0 : i32
    %c0_i32_0 = arith.constant 0 : i32
    %c0_i32_1 = arith.constant 0 : i32
    return %arg0, %c0_i32, %arg1, %c0_i32_0 : i32, i32, i32, i32
  }
}

</mosaic_0001>

<bundles_post_ra>
// kernel: tpu_custom_call.1
= control target key start
LH: loop header
LB: loop body
LE: loop exit
PB: predicated region body
PF: predicated region fallthrough
CT: control target
= control target key end

     0   :  { %6 = vsyncpa [#allocation3], 0  ;;  %s783_s0 = inlined_call_operand.hbm [shape: f32[8,5,2,128], index: 0, kind: input, shape index: {}]   ;;  %s784_s1 = inlined_call_operand.hbm [shape: f32[8,4,2,128], index: 1, kind: output, shape index: {}]  }
   0x1   :  { %8 = vsyncpa [#allocation3 + $0x1], 0 }
   0x2   :  { %9 = vsyncpa [#allocation4], 0 }
   0x3   :  { %11 = vsyncpa [#allocation4 + $0x1], 0  ;;  %s579_s6 = smov 0   ;;  %s581_s7 = smov 0  }
   0x4   :  { %s583_s8 = smov 0   ;;  %s585_s9 = smov 0  }
   0x5   :  { %s587_s10 = smov 0   ;;  %s589_s11 = smov 0  }
   0x6 LB: > { %s327_s12 = sadd.s32 4294967295, %s561_s11   ;;  %s328_s13 = sadd.s32 4294967294, %s561_s11   ;;  %s561_s11 = sphi %s589_s11, %s17_s11   ;;  %s557_s10 = sphi %s587_s10, %s795_s10   ;;  %s553_s9 = sphi %s585_s9, %s794_s9   ;;  %s549_s8 = sphi %s583_s8, %s793_s8   ;;  %s545_s7 = sphi %s581_s7, %s792_s7   ;;  %s541_s6 = sphi %s579_s6, %s791_s6  }
   0x7   : > { %s29_s14 = sadd.s32 1, %s557_s10  ;;  %s38_s15 = sadd.s32 1, %s549_s8 }
   0x8   : > { %p31_p0 = scmp.ge.s32.totalorder %s29_s14, 2  ;;  %p45_p1 = scmp.ne.s32.totalorder %s549_s8, %s545_s7 }
   0x9   : > { %p46_p2 = scmp.eq.s32.totalorder %s561_s11, 0  ;;  %p51_p3 = scmp.ne.s32.totalorder %s545_s7, %s541_s6 }
   0xa   : > { %s797_s14 = smov (%p31_p0, %s29_s14), 0  ;;  %p52_p5 = scmp.eq.s32.totalorder %s327_s12, 0 }
   0xb   : > { %p620_p4 = por %p46_p2, %p45_p1  ;;  %s33_s17 = ssub.s32 %s557_s10, %s797_s14 }
   0xc   : > { %p77_p6 = scmp.eq.s32.totalorder %s327_s12, 1  ;;  %p36_p7 = scmp.eq.s32.totalorder %s33_s17, 0 }
   0xd   : > { %p626_p8 = por %p52_p5, %p51_p3  ;;  %p83_p10 = scmp.eq.s32.totalorder %s328_s13, 1 }
   0xe   : > { %p630_p9 = por %p77_p6, %p45_p1  ;;  %p399_p13 = scmp.lt.s32.totalorder %s561_s11, 2 }
   0xf   : > { %s635_s20 = scalar_select %p36_p7, %s549_s8, %s38_s15  }
  0x10   : > { %p637_p11 = por %p83_p10, %p51_p3  ;;  %s103_s22 = sand.u32 1, %s549_s8  }
  0x11   : > { %s384_s23 = smul.u32 40, %s103_s22  ;;  %p647_p0 = pnand %p399_p13, %p620_p4 }
  0x12   : > { %s385_s24 = smul.u32 640, %s557_s10  ;;  %p334_p1 = scmp.ge.s32.totalorder %s561_s11, 1 }
  0x13   : > { %s107_s29 = scalar_lea.vmem [#allocation2], %s384_s23  ;;  %s104_s2 = scalar_lea.sflag [#allocation3], %s103_s22 }
  0x14   : > { %s115_s28 = scalar_lea.hbm %s783_s0, %s385_s24  ;;  %s116_s30 = sshll.u32 %s107_s29, 4  ;;  %s117_s30 = int_to_ptr.vmem [resolvable:$true] %s116_s30 }
  0x15   : > { %p455_p2 = pneg %p647_p0  ;;  %s466_s3 = scalar_lea.vmem %s117_s30, 640 }
  0x16   : > { %p467_p3 = scmp.ne.s32.totalorder %s117_s30, %s466_s3  ;;  %s563_s4 = smov [#allocation2]  }
  0x17   : > { %s471_s5 = sshll.u32 %s563_s4, 4  ;;  %s472_s5 = int_to_ptr.vmem [resolvable:$false] %s471_s5 }
  0x18   : > { %p469_p5 = pnand %p467_p3, %p455_p2  ;;  %s473_s12 = scalar_lea.vmem %s472_s5, 1280 }
  0x19   : > { %p474_p4 = scmp.lt.s32.totalorder %s117_s30, %s472_s5  ;;  %p475_p7 = scmp.lt.s32.totalorder %s473_s12, %s466_s3 }
  0x1a   : > { %p470_p6 = pneg %p469_p5 }
  0x1b   : > { %p476_p10 = por %p475_p7, %p474_p4 }
  0x1d   : > { %p477_p13 = pnand %p476_p10, %p470_p6 }
  0x1f   : > { %480 = shalt.err (!%p477_p13)
}
  0x20   : > { %s564_s13 = smov 32   ;;  %s565_s15 = smov 2  }
  0x21   : > { %394 = dma.hbm_to_vmem [thread:$0]  (!%p647_p0), %s115_s28, 640, %s117_s30, %s104_s2, %s564_s13, %s564_s13, %s565_s15  }
  0x22   : > { %p124_p12 = scmp.lt.s32.totalorder %s561_s11, 3 }
  0x24   : > { %p125_p2 = pnand %p334_p1, %p124_p12 }
  0x25   : > { %s663_s16 = sand.u32 (!%p125_p2), 1, %s545_s7  }
  0x26   : > { %128 = sbr.rel (%p125_p2) target bundleno = 82 (0x52), region = 24  ;;  %s131_s22 = scalar_lea.sflag (!%p125_p2), [#allocation3], %s663_s16 }
  0x27   : > { %s386_s17 = smul.u32 (!%p125_p2), 40, %s663_s16 }
  0x29   : > { %s667_s23 = scalar_lea.vmem (!%p125_p2), [#allocation2], %s386_s17 }
  0x2b   : > { %532 = dma.done.wait (%p626_p8), %s131_s22, 640  }
  0x2c   : > { %534 = vsyncadd (%p626_p8), %s131_s22, 4294966656  ;;  %s335_s24 = sshll.u32 %s663_s16, 5  ;;  %s383_s25 = sshll.u32 %s553_s9, 9  ;;  %v336_v0 = vld [vmem:[%s667_s23 + $0x2] sm:$0x3] }
  0x2d   : > { %s675_s26 = scalar_lea.vmem [#allocation5], %s335_s24  ;;  %v160_v1 = vld [vmem:[%s667_s23] sm:$0x3]  ;;  %v337_v2 = vld [vmem:[%s667_s23 + $0xc] sm:$0x3]  ;;  %s727_s29 = scalar_lea.hbm %s784_s1, %s383_s25 }
  0x2e   : > { %s242_s18 = sshll.u32 %s675_s26, 4  ;;  %v164_v3 = vsub.f32 %v336_v0, %v160_v1  ;;  %v161_v4 = vld [vmem:[%s667_s23 + $0xa] sm:$0x3]  ;;  %v338_v5 = vld [vmem:[%s667_s23 + $0x16] sm:$0x3]  ;;  %s227_s30 = scalar_lea.sflag [#allocation4], %s663_s16  ;;  %s731_s18 = int_to_ptr.vmem [resolvable:$true] %s242_s18 }
  0x2f   : > { %v162_v6 = vld [vmem:[%s667_s23 + $0x14] sm:$0x3]  ;;  %v165_v7 = vsub.f32 %v337_v2, %v161_v4  ;;  %v339_v9 = vld [vmem:[%s667_s23 + $0x20] sm:$0x3]  ;;  %v163_v10 = vld [vmem:[%s667_s23 + $0x1e] sm:$0x3] }
  0x30   : > { %v166_v8 = vsub.f32 %v338_v5, %v162_v6  ;;  %v340_v11 = vld [vmem:[%s667_s23 + $0x4] sm:$0x3]  ;;  %168 = vst [vmem:[%s675_s26] sm:$0x3] %v164_v3  ;;  %v167_v12 = vsub.f32 %v339_v9, %v163_v10  ;;  %v344_v13 = vld [vmem:[%s667_s23 + $0x2] sm:$0x3]  ;;  %s481_s2 = scalar_lea.vmem %s731_s18, 512 }
  0x31   : > { %v341_v14 = vld [vmem:[%s667_s23 + $0xe] sm:$0x3]  ;;  %v345_v15 = vld [vmem:[%s667_s23 + $0xc] sm:$0x3]  ;;  %169 = vst [vmem:[%s675_s26 + $0x8] sm:$0x3] %v165_v7  ;;  %v181_v16 = vsub.f32 %v340_v11, %v344_v13  ;;  %p482_p8 = scmp.ne.s32.totalorder %s731_s18, %s481_s2 }
  0x32   : > { %170 = vst [vmem:[%s675_s26 + $0x10] sm:$0x3] %v166_v8  ;;  %v182_v17 = vsub.f32 %v341_v14, %v345_v15  ;;  %v342_v18 = vld [vmem:[%s667_s23 + $0x18] sm:$0x3]  ;;  %v346_v19 = vld [vmem:[%s667_s23 + $0x16] sm:$0x3] }
  0x33   : > { %v343_v20 = vld [vmem:[%s667_s23 + $0x22] sm:$0x3]  ;;  %171 = vst [vmem:[%s675_s26 + $0x18] sm:$0x3] %v167_v12  ;;  %v183_v21 = vsub.f32 %v342_v18, %v346_v19  ;;  %v347_v22 = vld [vmem:[%s667_s23 + $0x20] sm:$0x3]  ;;  %p483_p12 = pnand %p482_p8, %p630_p9 }
  0x34   : > { %v352_v23 = vld [vmem:[%s667_s23 + $0x6] sm:$0x3]  ;;  %v356_v24 = vld [vmem:[%s667_s23 + $0x4] sm:$0x3]  ;;  %348 = vst [vmem:[%s675_s26 + $0x2] sm:$0x3] %v181_v16  ;;  %v184_v25 = vsub.f32 %v343_v20, %v347_v22 }
  0x35   : > { %349 = vst [vmem:[%s675_s26 + $0xa] sm:$0x3] %v182_v17  ;;  %v199_v26 = vsub.f32 %v352_v23, %v356_v24  ;;  %v353_v27 = vld [vmem:[%s667_s23 + $0x10] sm:$0x3]  ;;  %v357_v28 = vld [vmem:[%s667_s23 + $0xe] sm:$0x3]  ;;  %p484_p0 = pneg %p483_p12 }
  0x36   : > { %v354_v29 = vld [vmem:[%s667_s23 + $0x1a] sm:$0x3]  ;;  %350 = vst [vmem:[%s675_s26 + $0x12] sm:$0x3] %v183_v21  ;;  %v200_v30 = vsub.f32 %v353_v27, %v357_v28  ;;  %v358_v31 = vld [vmem:[%s667_s23 + $0x18] sm:$0x3] }
  0x37   : > { %v355_v32 = vld [vmem:[%s667_s23 + $0x24] sm:$0x3]  ;;  %v359_v33 = vld [vmem:[%s667_s23 + $0x22] sm:$0x3]  ;;  %351 = vst [vmem:[%s675_s26 + $0x1a] sm:$0x3] %v184_v25  ;;  %v201_v34 = vsub.f32 %v354_v29, %v358_v31 }
  0x38   : > { %360 = vst [vmem:[%s675_s26 + $0x4] sm:$0x3] %v199_v26  ;;  %v202_v35 = vsub.f32 %v355_v32, %v359_v33  ;;  %v364_v36 = vld [vmem:[%s667_s23 + $0x8] sm:$0x3]  ;;  %v368_v37 = vld [vmem:[%s667_s23 + $0x6] sm:$0x3] }
  0x39   : > { %v365_v38 = vld [vmem:[%s667_s23 + $0x12] sm:$0x3]  ;;  %361 = vst [vmem:[%s675_s26 + $0xc] sm:$0x3] %v200_v30  ;;  %v217_v39 = vsub.f32 %v364_v36, %v368_v37  ;;  %v369_v40 = vld [vmem:[%s667_s23 + $0x10] sm:$0x3] }
  0x3a   : > { %v366_v41 = vld [vmem:[%s667_s23 + $0x1c] sm:$0x3]  ;;  %v370_v42 = vld [vmem:[%s667_s23 + $0x1a] sm:$0x3]  ;;  %362 = vst [vmem:[%s675_s26 + $0x14] sm:$0x3] %v201_v34  ;;  %v218_v43 = vsub.f32 %v365_v38, %v369_v40 }
  0x3b   : > { %363 = vst [vmem:[%s675_s26 + $0x1c] sm:$0x3] %v202_v35  ;;  %v219_v44 = vsub.f32 %v366_v41, %v370_v42  ;;  %v367_v45 = vld [vmem:[%s667_s23 + $0x26] sm:$0x3]  ;;  %v371_v46 = vld [vmem:[%s667_s23 + $0x24] sm:$0x3] }
  0x3c   : > { %372 = vst [vmem:[%s675_s26 + $0x6] sm:$0x3] %v217_v39  ;;  %v220_v47 = vsub.f32 %v367_v45, %v371_v46  ;;  %373 = vst [vmem:[%s675_s26 + $0xe] sm:$0x3] %v218_v43  ;;  %s566_s9 = smov [#allocation5]  }
  0x3d   : > { %374 = vst [vmem:[%s675_s26 + $0x16] sm:$0x3] %v219_v44  ;;  %s485_s3 = sshll.u32 %s566_s9, 4  ;;  %s486_s3 = int_to_ptr.vmem [resolvable:$false] %s485_s3 }
  0x3e   : > { %375 = vst [vmem:[%s675_s26 + $0x1e] sm:$0x3] %v220_v47  ;;  %s487_s4 = scalar_lea.vmem %s486_s3, 1024  ;;  %p488_p1 = scmp.lt.s32.totalorder %s731_s18, %s486_s3 }
  0x3f   : > { %p489_p3 = scmp.lt.s32.totalorder %s487_s4, %s481_s2 }
  0x41   : > { %p490_p5 = por %p489_p3, %p488_p1 }
  0x43   : > { %p491_p6 = pnand %p490_p5, %p484_p0 }
  0x45   : > { %494 = shalt.err (!%p491_p6)
}
  0x46   : > { %s495_s5 = scalar_lea.hbm %s727_s29, 512  ;;  %s499_s15 = scalar_lea.hbm %s784_s1, 1024 }
  0x47   : > { %p496_p4 = scmp.ne.s32.totalorder %s727_s29, %s495_s5  ;;  %p500_p13 = scmp.lt.s32.totalorder %s727_s29, %s784_s1 }
  0x48   : > { %p501_p2 = scmp.lt.s32.totalorder %s499_s15, %s495_s5 }
  0x49   : > { %p497_p7 = pnand %p496_p4, %p630_p9 }
  0x4a   : > { %p502_p8 = por %p501_p2, %p500_p13 }
  0x4b   : > { %p498_p10 = pneg %p497_p7 }
  0x4d   : > { %p503_p12 = pnand %p502_p8, %p498_p10 }
  0x4f   : > { %506 = shalt.err (!%p503_p12)
}
  0x50   : > { %s567_s23 = smov 32   ;;  %s568_s24 = smov 2  }
  0x51   : > { %389 = dma.vmem_to_hbm [thread:$0]  (%p630_p9), %s731_s18, 512, %s727_s29, %s227_s30, %s567_s23, %s567_s23, %s568_s24  }
  0x52 PF: > { %s257_s25 = sand.u32 1, %s541_s6   ;;  %p790_p0 = scmp.ge.s32.totalorder %s561_s11, 2 }
  0x53   : > { %s258_s26 = scalar_lea.sflag [#allocation4], %s257_s25 }
  0x54   : > { %p396_p1 = pnand %p790_p0, %p637_p11 }
  0x56   : > { %p397_p3 = pneg %p396_p1 }
  0x58   : > { %536 = dma.done.wait (%p397_p3), %s258_s26, 512  }
  0x59   : > { %538 = vsyncadd (%p397_p3), %s258_s26, 4294966784  ;;  %s17_s11 = sadd.s32 1, %s561_s11   ;;  %s791_s6 = smov %s545_s7 }
  0x5a   : > { %p14_p5 = scmp.ge.s32.totalorder %s17_s11, 4   ;;  %s792_s7 = smov %s549_s8 }
  0x5b   : > { %s793_s8 = smov %s635_s20  ;;  %s794_s9 = smov %s557_s10 }
  0x5c   : > { %s795_s10 = smov %s797_s14  ;;  %16 = sbr.rel (!%p14_p5) target bundleno = 6 (0x6), region = 76 }
  0x61   :  { %263 = vsyncpa [#allocation3], 1 }
  0x62   :  { %265 = vsyncpa [#allocation3 + $0x1], 1 }
  0x63   :  { %266 = vsyncpa [#allocation4], 1 }
  0x64   :  { %268 = vsyncpa [#allocation4 + $0x1], 1 }

</bundles_post_ra>
